<compile_context>
chip_gen: v7x
topology: tpu7x:2x2x1
jax: 0.10.0
libtpu: 0.0.40
codegen_flags: <defaults>
</compile_context>

<pallas_src>
import jax
import jax.numpy as jnp
import numpy as np
from jax.experimental import pallas as pl
from jax.experimental.pallas import tpu as pltpu


_BLOCK_BUDGET_BYTES = 8 << 20        # ~8 MiB x-block; double-buffered pair ~16 MiB
_VMEM_LIMIT_BYTES = 48 * 1024 * 1024  # safe on v7x (64 MiB phys), ample on v5e/v6e


def _round_up(x, m):
    return ((x + m - 1) // m) * m


def _choose_h_tile(H, Bt, itemsize, budget, want_parallel):
    """Pick an H tile: a multiple of 128 dividing H, or H itself."""
    if H % 128 != 0 or H <= 128:
        return H
    divs = [d for d in range(128, H + 1, 128) if H % d == 0]
    fit = [d for d in divs if Bt * 128 * d * itemsize <= budget] or [128]
    ht = max(fit)
    if want_parallel and ht == H and len(divs) > 1:
        # Populate the parallel H axis (>=2 tiles) so both v7x TensorCores
        # stream HBM when the batch axis has only a single tile.
        ht = max(d for d in divs if d < H)
    return ht


def _choose_seq_tile(S, row_bytes, budget):
    """Returns (TS, S_pad). Single full-extent tile if S fits the budget."""
    cap = max(128, (budget // max(row_bytes, 1)) // 128 * 128)
    if S <= cap:
        return S, S                  # block equals full S dim -> always legal
    # Multi-tile: TS must be a multiple of 128. Prefer a divisor near cap so no
    # padding is needed; otherwise pad the tail (masked in-kernel).
    ts = cap
    while ts >= max(128, cap // 2):
        if S % ts == 0:
            return ts, S
        ts -= 128
    return cap, _round_up(S, cap)


def _make_pool_kernel(pooling_type, has_mask, TS, S_orig, s_has_pad, inv_seq_len):
    """Returns a Pallas kernel body closed over the pooling configuration."""
    need_mean = pooling_type in ("mean", "synthetic")
    need_max = pooling_type in ("max", "synthetic")

    def kernel(*refs):
        i = 0
        x_ref = refs[i]; i += 1
        m_ref = None
        if has_mask:
            m_ref = refs[i]; i += 1
        out_ref = refs[i]; i += 1
        scratch = refs[i:]

        j = 0
        sum_acc = cnt_acc = max_acc = None
        if need_mean:
            sum_acc = scratch[j]; j += 1
            if has_mask:
                cnt_acc = scratch[j]; j += 1
        if need_max:
            max_acc = scratch[j]; j += 1

        s_idx = pl.program_id(2)

        @pl.when(s_idx == 0)
        def _init():
            if need_mean:
                sum_acc[...] = jnp.zeros_like(sum_acc)
                if has_mask:
                    cnt_acc[...] = jnp.zeros_like(cnt_acc)
            if need_max:
                max_acc[...] = jnp.full(max_acc.shape, -jnp.inf, max_acc.dtype)

        # Validity of sequence positions (only needed on the max path when the
        # wrapper zero-padded S to a multiple of the tile).
        valid = None
        if need_max and s_has_pad:
            pos = s_idx * TS + jax.lax.broadcasted_iota(jnp.int32, (TS, 1), 0)
            valid = pos < S_orig                                 # (TS, 1)

        if has_mask:
            m = m_ref[...].astype(jnp.float32)                   # (Bt, TS)
            m3 = m[:, :, None]                                   # (Bt, TS, 1)
            xm = x_ref[...].astype(jnp.float32) * m3             # x = x * mask
            if need_mean:
                # Zero-padded x/mask contribute nothing to sum or count.
                sum_acc[...] += jnp.sum(xm, axis=1)
                cnt_acc[...] += jnp.sum(m, axis=1, keepdims=True)
            if need_max:
                # Faithful to the module: bias = (mask - 1) * -1e9.
                biased = xm + (m3 - 1.0) * -1.0e9
                if valid is not None:
                    biased = jnp.where(valid, biased, -jnp.inf)
                max_acc[...] = jnp.maximum(max_acc[...], jnp.max(biased, axis=1))
        else:
            if need_mean:
                # Zero-padded tail contributes 0; finalize divides by real S.
                sum_acc[...] += jnp.sum(x_ref[...].astype(jnp.float32), axis=1)
            if need_max:
                xv = x_ref[...]                                  # native dtype (max exact)
                if valid is not None:
                    xv = jnp.where(valid, xv, jnp.finfo(xv.dtype).min)
                max_acc[...] = jnp.maximum(
                    max_acc[...], jnp.max(xv, axis=1).astype(jnp.float32))

        @pl.when(s_idx == pl.num_programs(2) - 1)
        def _finalize():
            mean_p = max_p = None
            if need_mean:
                if has_mask:
                    mean_p = sum_acc[...] / (cnt_acc[...] + 1e-6)
                else:
                    mean_p = sum_acc[...] * inv_seq_len
            if need_max:
                max_p = max_acc[...]

            if pooling_type == "mean":
                out_ref[...] = mean_p.astype(out_ref.dtype)
            elif pooling_type == "max":
                out_ref[...] = max_p.astype(out_ref.dtype)
            else:  # synthetic: static ref-slice writes into the (Bt, 2, Ht) block
                out_ref[:, 0, :] = mean_p.astype(out_ref.dtype)
                out_ref[:, 1, :] = max_p.astype(out_ref.dtype)

    return kernel


def pooling_forward(x, mask=None, pooling_type="mean", seq_tile=None):
    """Pallas implementation of Pooling.forward.

    x:    [B, S, H] float array
    mask: optional [B, S] array (0/1 float or bool)
    """
    if pooling_type not in ("mean", "max", "synthetic"):
        raise ValueError(f"Unknown pooling type: {pooling_type}")

    B, S, H = x.shape
    has_mask = mask is not None
    itemsize = jnp.dtype(x.dtype).itemsize

    # Batch tiling: 8 sublane rows per block; pad B to a multiple of 8 so a
    # non-divisible batch never produces a giant (B, TS, H) block.
    if B >= 8:
        Bt = 8
        B_pad = _round_up(B, 8)
    else:
        Bt = B
        B_pad = B
    nb = B_pad // Bt

    # Hidden tiling: bounds block bytes for large H; splits H when nb == 1 so
    # the parallel grid has >=2 iterations (v7x megacore).
    Ht = _choose_h_tile(H, Bt, itemsize, _BLOCK_BUDGET_BYTES, want_parallel=(nb == 1))
    nh = H // Ht

    # Sequence tiling (budgeted ~8 MiB per x block; pad tail if non-divisible).
    if seq_tile is None:
        TS, S_pad = _choose_seq_tile(S, Bt * Ht * itemsize, _BLOCK_BUDGET_BYTES)
    else:
        TS = int(seq_tile)
        if TS != S and TS % 128 != 0:
            raise ValueError("seq_tile must equal S or be a multiple of 128")
        S_pad = _round_up(S, TS)
    ns = S_pad // TS
    s_has_pad = S_pad != S

    if has_mask:
        mask = mask.astype(x.dtype)
    if (B_pad != B) or s_has_pad:
        x = jnp.pad(x, ((0, B_pad - B), (0, S_pad - S), (0, 0)))
        if has_mask:
            mask = jnp.pad(mask, ((0, B_pad - B), (0, S_pad - S)))

    kernel = _make_pool_kernel(pooling_type, has_mask, TS, S, s_has_pad, 1.0 / S)

    in_specs = [pl.BlockSpec((Bt, TS, Ht), lambda b, h, s: (b, s, h))]
    args = [x]
    if has_mask:
        in_specs.append(pl.BlockSpec((Bt, TS), lambda b, h, s: (b, s)))
        args.append(mask)

    if pooling_type == "synthetic":
        out_shape = jax.ShapeDtypeStruct((B_pad, 2, H), x.dtype)
        out_spec = pl.BlockSpec((Bt, 2, Ht), lambda b, h, s: (b, 0, h))
        out_bytes = B * 2 * H * itemsize
    else:
        out_shape = jax.ShapeDtypeStruct((B_pad, H), x.dtype)
        out_spec = pl.BlockSpec((Bt, Ht), lambda b, h, s: (b, h))
        out_bytes = B * H * itemsize

    need_mean = pooling_type in ("mean", "synthetic")
    need_max = pooling_type in ("max", "synthetic")
    scratch_shapes = []
    if need_mean:
        scratch_shapes.append(pltpu.VMEM((Bt, Ht), jnp.float32))      # running sum
        if has_mask:
            scratch_shapes.append(pltpu.VMEM((Bt, 1), jnp.float32))   # mask count
    if need_max:
        scratch_shapes.append(pltpu.VMEM((Bt, Ht), jnp.float32))      # running max

    bytes_accessed = B * S * H * itemsize + out_bytes
    if has_mask:
        bytes_accessed += B * S * itemsize
    flops = 2 * B * S * H * (2 if pooling_type == "synthetic" else 1)

    out = pl.pallas_call(
        kernel,
        out_shape=out_shape,
        grid_spec=pltpu.PrefetchScalarGridSpec(
            num_scalar_prefetch=0,
            grid=(nb, nh, ns),                 # reduction (S) axis last
            in_specs=in_specs,
            out_specs=out_spec,
            scratch_shapes=scratch_shapes,
        ),
        compiler_params=pltpu.CompilerParams(
            dimension_semantics=("parallel", "parallel", "arbitrary"),
            vmem_limit_bytes=_VMEM_LIMIT_BYTES,
        ),
        cost_estimate=pl.CostEstimate(
            flops=flops, transcendentals=0, bytes_accessed=bytes_accessed),
    )(*args)

    if pooling_type == "synthetic":
        return out[:B].reshape(B, 2 * H)
    return out[:B]


def _reference(x, mask, pooling_type):
    """Pure-JAX reference mirroring the PyTorch module exactly."""
    if mask is not None:
        m = mask.astype(x.dtype)[..., None]
        xm = x * m
        mean_p = xm.sum(axis=1) / (m.sum(axis=1) + 1e-6)
        max_p = (xm + (m - 1.0) * -1.0e9).max(axis=1)
    else:
        mean_p = x.mean(axis=1)
        max_p = x.max(axis=1)
    if pooling_type == "mean":
        return mean_p
    if pooling_type == "max":
        return max_p
    return jnp.concatenate([mean_p, max_p], axis=-1)


if __name__ == "__main__":
    key = jax.random.PRNGKey(0)

    configs = [
        # (B, S, H, seq_tile); seq_tile=None lets the wrapper choose.
        (2, 8, 32, None),      # tiny shapes, single S tile
        (2, 256, 32, 128),     # 2 S-tiles -> accumulator path
        (16, 8, 32, None),     # two batch tiles, sublane-dense output
        (3, 200, 32, 128),     # ragged S -> padded tail + in-kernel valid mask
        (10, 40, 32, None),    # B not a multiple of 8 -> batch padding
        (2, 64, 256, None),    # H multiple of 128 -> H-tiled parallel axis
    ]

    ok = True
    for B, S, H, st in configs:
        key, kx, km = jax.random.split(key, 3)
        x = jax.random.normal(kx, (B, S, H), dtype=jnp.float32)
        mask = (jax.random.uniform(km, (B, S)) > 0.3).astype(jnp.float32)
        # Guarantee each sequence has at least one valid token.
        mask = mask.at[:, 0].set(1.0)

        for ptype in ("mean", "max", "synthetic"):
            for m in (None, mask):
                got = pooling_forward(x, m, pooling_type=ptype, seq_tile=st)
                got = jax.block_until_ready(got)
                ref = _reference(x, m, ptype)
                if not np.allclose(np.asarray(got), np.asarray(ref),
                                   atol=1e-4, rtol=1e-4):
                    ok = False

    if ok:
        print("KERNEL_OK")
</pallas_src>

<mosaic_0001>
module attributes {stable_mosaic.version = 11 : i64} {
  func.func @kernel(%arg0: i32, %arg1: i32, %arg2: i32, %arg3: memref<2x8x32xf32, #tpu.memory_space<vmem>>, %arg4: memref<2x32xf32, #tpu.memory_space<vmem>>, %arg5: memref<2x32xf32, #tpu.memory_space<vmem>>) attributes {dimension_semantics = [#tpu.dimension_semantics<parallel>, #tpu.dimension_semantics<parallel>, #tpu.dimension_semantics<arbitrary>], iteration_bounds = array<i64: 1, 1, 1>, scalar_prefetch = 0 : i64, scratch_operands = 1 : i64, tpu.core_type = #tpu.core_type<tc>, window_params = [{transform_indices = @transform_0, window_bounds = array<i64: 2, 8, 32>}, {transform_indices = @transform_1, window_bounds = array<i64: 2, 32>}]} {
    %c0_i32 = arith.constant 0 : i32
    %0 = arith.cmpi eq, %arg2, %c0_i32 : i32
    %1 = arith.extui %0 : i1 to i32
    %c0_i32_0 = arith.constant 0 : i32
    %2 = arith.cmpi ne, %1, %c0_i32_0 : i32
    scf.if %2 {
      %cst_9 = arith.constant 0.000000e+00 : f32
      %11 = vector.broadcast %cst_9 : f32 to vector<2x32xf32>
      %c0_10 = arith.constant 0 : index
      %c0_11 = arith.constant 0 : index
      %12 = vector.load %arg5[%c0_10, %c0_11] : memref<2x32xf32, #tpu.memory_space<vmem>>, vector<2x32xf32>
      tpu.vector_store %arg5[%c0_10, %c0_11], %11 {strides = array<i32>} : memref<2x32xf32, #tpu.memory_space<vmem>>, vector<2x32xf32>,
    } else {
    }
    %c0 = arith.constant 0 : index
    %c0_1 = arith.constant 0 : index
    %3 = vector.load %arg5[%c0, %c0_1] : memref<2x32xf32, #tpu.memory_space<vmem>>, vector<2x32xf32>
    %c0_2 = arith.constant 0 : index
    %c0_3 = arith.constant 0 : index
    %c0_4 = arith.constant 0 : index
    %4 = vector.load %arg3[%c0_2, %c0_3, %c0_4] : memref<2x8x32xf32, #tpu.memory_space<vmem>>, vector<2x8x32xf32>
    %cst = arith.constant dense<0.000000e+00> : vector<2x32xf32>
    %5 = vector.multi_reduction <add>, %4, %cst [1] : vector<2x8x32xf32> to vector<2x32xf32>
    %6 = arith.addf %3, %5 : vector<2x32xf32>
    %c0_5 = arith.constant 0 : index
    %c0_6 = arith.constant 0 : index
    %7 = vector.load %arg5[%c0_5, %c0_6] : memref<2x32xf32, #tpu.memory_space<vmem>>, vector<2x32xf32>
    tpu.vector_store %arg5[%c0_5, %c0_6], %6 {strides = array<i32>} : memref<2x32xf32, #tpu.memory_space<vmem>>, vector<2x32xf32>,
    %c0_i32_7 = arith.constant 0 : i32
    %8 = arith.cmpi eq, %arg2, %c0_i32_7 : i32
    %9 = arith.extui %8 : i1 to i32
    %c0_i32_8 = arith.constant 0 : i32
    %10 = arith.cmpi ne, %9, %c0_i32_8 : i32
    scf.if %10 {
      %c0_9 = arith.constant 0 : index
      %c0_10 = arith.constant 0 : index
      %11 = vector.load %arg5[%c0_9, %c0_10] : memref<2x32xf32, #tpu.memory_space<vmem>>, vector<2x32xf32>
      %cst_11 = arith.constant 1.250000e-01 : f32
      %12 = vector.broadcast %cst_11 : f32 to vector<2x32xf32>
      %13 = arith.mulf %11, %12 : vector<2x32xf32>
      %c0_12 = arith.constant 0 : index
      %c0_13 = arith.constant 0 : index
      %14 = vector.load %arg4[%c0_12, %c0_13] : memref<2x32xf32, #tpu.memory_space<vmem>>, vector<2x32xf32>
      tpu.vector_store %arg4[%c0_12, %c0_13], %13 {strides = array<i32>} : memref<2x32xf32, #tpu.memory_space<vmem>>, vector<2x32xf32>,
    } else {
    }
    return
  }
  func.func @transform_0(%arg0: i32, %arg1: i32, %arg2: i32) -> (i32, i32, i32) {
    %c0_i32 = arith.constant 0 : i32
    return %arg0, %arg2, %arg1 : i32, i32, i32
  }
  func.func @transform_1(%arg0: i32, %arg1: i32, %arg2: i32) -> (i32, i32) {
    %c0_i32 = arith.constant 0 : i32
    return %arg0, %arg1 : i32, i32
  }
}

</mosaic_0001>

<bundles_post_ra>
// kernel: tpu_custom_call.1
= control target key start
LH: loop header
LB: loop body
LE: loop exit
PB: predicated region body
PF: predicated region fallthrough
CT: control target
= control target key end

     0   :  { %6 = vsyncpa [#allocation4], 0  ;;  %s171_s0 = inlined_call_operand.hbm [shape: f32[2,8,32], index: 0, kind: input, shape index: {}]   ;;  %s172_s1 = inlined_call_operand.hbm [shape: f32[2,32], index: 1, kind: output, shape index: {}]  }
   0x1   :  { %7 = vsyncpa [#allocation5], 0  ;;  %s129_s6 = smov [#allocation3]   ;;  %s81_s10 = scalar_lea.hbm %s171_s0, 256 }
   0x2   :  { %s13_s7 = sshll.u32 %s129_s6, 4  ;;  %p82_p0 = scmp.ne.s32.totalorder %s171_s0, %s81_s10  ;;  %s14_s7 = int_to_ptr.vmem [resolvable:$true] %s13_s7 }
   0x3   :  { %p85_p1 = scmp.lt.u32.totalorder %s81_s10, %s171_s0 }
   0x5   :  { %p87_p2 = pnand %p85_p1, %p82_p0 }
   0x7   :  { %90 = shalt.err (!%p87_p2)
}
   0x8   :  { %s91_s15 = scalar_lea.vmem %s14_s7, 256  ;;  %p96_p4 = scmp.lt.s32.totalorder %s14_s7, %s14_s7 }
   0x9   :  { %p92_p3 = scmp.ne.s32.totalorder %s14_s7, %s91_s15  ;;  %p97_p5 = scmp.lt.s32.totalorder %s91_s15, %s91_s15 }
   0xb   :  { %p98_p6 = por %p97_p5, %p96_p4 }
   0xd   :  { %p99_p7 = pnand %p98_p6, %p92_p3 }
   0xf   :  { %102 = shalt.err (!%p99_p7)
}
  0x10   :  { %s130_s16 = smov 128   ;;  %s131_s17 = smov 8  }
  0x11   :  { %19 = dma.hbm_to_vmem [thread:$0]  %s171_s0, 256, %s14_s7, [#allocation4], %s130_s16, %s130_s16, %s131_s17  }
  0x12   :  { %125 = dma.done.wait [#allocation4], 256  }
  0x13   :  { %126 = vsyncadd [#allocation4], 4294967040  ;;  %vm27_vm0 = vcmask 254976   ;;  %v132_v0 = vmov 0.0   ;;  %vm32_vm1 = vcmask 261120   ;;  %v30_v1 = vld [vmem:[#allocation3] sm:$0xff] }
  0x14   :  { %28 = vst.msk [vmem:[#allocation2] sm:$0x3] %vm27_vm0, %v132_v0  ;;  %v31_v2 = vld [vmem:[#allocation3 + $0x8] sm:$0xff]  ;;  %v33_v3 = vsel %vm32_vm1, %v30_v1, 0.0  ;;  %vm49_vm2 = vcmask 1041409   ;;  %s133_s0 = smov [#allocation6]  }
  0x15   :  { %v40_v4 = vsel %vm32_vm1, %v31_v2, 0.0  ;;  %v34_v5 = vrot.slane %v33_v3, 4  ;;  %s67_s20 = sshll.u32 %s133_s0, 4  ;;  %s68_s20 = int_to_ptr.vmem [resolvable:$true] %s67_s20 }
  0x16   :  { %v41_v6 = vrot.slane %v40_v4, 4  ;;  %s103_s21 = scalar_lea.vmem %s68_s20, 32  ;;  %p108_p9 = scmp.lt.s32.totalorder %s68_s20, %s68_s20 }
  0x17   :  { %v35_v7 = vadd.f32 %v34_v5, %v33_v3  ;;  %p104_p8 = scmp.ne.s32.totalorder %s68_s20, %s103_s21  ;;  %p109_p10 = scmp.lt.s32.totalorder %s103_s21, %s103_s21 }
  0x18   :  { %v42_v8 = vadd.f32 %v41_v6, %v40_v4 }
  0x19   :  { %v36_v9 = vrot.slane %v35_v7, 2  ;;  %p110_p11 = por %p109_p10, %p108_p9 }
  0x1a   :  { %v43_v10 = vrot.slane %v42_v8, 2 }
  0x1b   :  { %v37_v11 = vadd.f32 %v36_v9, %v35_v7  ;;  %v29_v15 = vld [vmem:[#allocation2] sm:$0x3]  ;;  %p111_p12 = pnand %p110_p11, %p104_p8 }
  0x1c   :  { %v44_v12 = vadd.f32 %v43_v10, %v42_v8 }
  0x1d   :  { %v38_v13 = vrot.slane %v37_v11, 1 }
  0x1e   :  { %v45_v14 = vrot.slane %v44_v12, 1 }
  0x1f   :  { %v39_v16 = vadd.f32 %v38_v13, %v37_v11 }
  0x20   :  { %v46_v17 = vadd.f32 %v45_v14, %v44_v12 }
  0x22   :  { %v50_v18 = vsel %vm49_vm2, %v46_v17, %v39_v16 }
  0x23   :  { %v52_v19 = vadd.f32 %v50_v18, %v29_v15 }
  0x25   :  { %54 = vst.msk [vmem:[#allocation2] sm:$0x3] %vm27_vm0, %v52_v19 }
  0x2c   :  { %v58_v20 = vld [vmem:[#allocation2] sm:$0x3] }
  0x2d   :  { %v59_v21 = vmul.f32 0.125, %v58_v20 }
  0x2f   :  { %60 = vst.msk [vmem:[#allocation6] sm:$0x3] %vm27_vm0, %v59_v21 }
  0x30   :  { %114 = shalt.err (!%p111_p12)
}
  0x31   :  { %s115_s24 = scalar_lea.hbm %s172_s1, 32 }
  0x32   :  { %p116_p13 = scmp.ne.s32.totalorder %s172_s1, %s115_s24  ;;  %p119_p0 = scmp.lt.u32.totalorder %s115_s24, %s172_s1 }
  0x34   :  { %p121_p1 = pnand %p119_p0, %p116_p13 }
  0x36   :  { %124 = shalt.err (!%p121_p1)
}
  0x37   :  { %70 = dma.vmem_to_hbm [thread:$0]  %s68_s20, 32, %s172_s1, [#allocation5]  }
  0x38   :  { %127 = dma.done.wait [#allocation5], 32  }
  0x39   :  { %128 = vsyncadd [#allocation5], 4294967264 }
  0x3a   :  { %74 = vsyncpa [#allocation4], 1 }
  0x3b   :  { %75 = vsyncpa [#allocation5], 1 }

</bundles_post_ra>
